<compile_context>
chip_gen: v7x
topology: tpu7x:2x2x1
jax: 0.10.0
libtpu: 0.0.40
codegen_flags: <defaults>
</compile_context>

<pallas_src>
import numpy as np
import jax
import jax.numpy as jnp
from jax import lax
from jax.experimental import pallas as pl
from jax.experimental.pallas import tpu as pltpu


def _pick_batch_tile(B, max_tb=8):
    """Largest divisor of B that is <= max_tb while keeping >= 2 grid steps
    (so both TensorCores get work on v7x).  max_tb is conservative so the
    (double-buffered, lane-padded) blocks stay far under v7x's 64 MiB VMEM."""
    best = 1
    for tb in range(1, min(B, max_tb) + 1):
        if B % tb == 0 and (B // tb >= 2 or B == 1):
            best = tb
    return best


def _make_kernel(C, V, in_off, out_w, use_matching, compute_is_scores):
    o_obj = in_off['obj_logits']
    o_verb = in_off['verb_logits']
    o_sub = in_off['sub_boxes']
    o_objb = in_off['obj_boxes']
    o_match = in_off.get('matching_logits', None)
    o_is = in_off.get('is_logits', None)

    def kernel(in_ref, wh_ref, out_ref):
        # ---- object-class softmax: score & label over foreground classes ----
        logits = in_ref[:, :, o_obj:o_obj + C].astype(jnp.float32)      # (TB,Q,C)
        m_all = jnp.max(logits, axis=-1, keepdims=True)
        denom = jnp.sum(jnp.exp(logits - m_all), axis=-1, keepdims=True)
        col = lax.broadcasted_iota(jnp.int32, logits.shape, 2)
        fg = jnp.where(col < C - 1, logits, -jnp.inf)                   # drop "no object"
        m_fg = jnp.max(fg, axis=-1, keepdims=True)
        obj_scores = jnp.exp(m_fg - m_all) / denom                      # (TB,Q,1)
        # argmax over the raw logits (ties -> smallest index); equivalent to
        # argmax of softmax[..., :-1] and avoids float equality on a division.
        obj_labels = jnp.min(jnp.where(fg == m_fg, col, C), axis=-1, keepdims=True)
        labels_f32 = obj_labels.astype(jnp.float32)   # class ids tiny -> exact in f32

        # ---- verb scores: sigmoid(verb_logits) * obj_score [* matching] ----
        verb = jax.nn.sigmoid(in_ref[:, :, o_verb:o_verb + V].astype(jnp.float32))
        vs = verb * obj_scores
        ms = None
        if use_matching:
            ml = in_ref[:, :, o_match:o_match + 2].astype(jnp.float32)
            ms = jax.nn.sigmoid(ml[:, :, 1:2] - ml[:, :, 0:1])          # softmax[...,1]
            vs = vs * ms
        is_s = None
        if compute_is_scores:
            il = in_ref[:, :, o_is:o_is + 2].astype(jnp.float32)
            is_s = jax.nn.sigmoid(il[:, :, 1:2] - il[:, :, 0:1])

        # ---- boxes: cxcywh -> xyxy, scaled by per-batch (w, h) ----
        wh = wh_ref[...].astype(jnp.float32)                            # (TB,1,2)

        def to_xyxy_scaled(off):
            b = in_ref[:, :, off:off + 4].astype(jnp.float32)
            c, s = b[:, :, 0:2], b[:, :, 2:4]
            lo = (c - 0.5 * s) * wh                                     # (xmin,ymin)*(w,h)
            hi = (c + 0.5 * s) * wh                                     # (xmax,ymax)*(w,h)
            return lo, hi

        sub_lo, sub_hi = to_xyxy_scaled(o_sub)
        obj_lo, obj_hi = to_xyxy_scaled(o_objb)

        # ---- single lane-dense packed store: one writeback DMA per step ----
        pieces = [vs, sub_lo, sub_hi, obj_lo, obj_hi, obj_scores, labels_f32]
        if use_matching:
            pieces.append(ms)
        if compute_is_scores:
            pieces.append(is_s)
        used = sum(int(p.shape[-1]) for p in pieces)
        if out_w > used:
            pieces.append(jnp.zeros(vs.shape[:-1] + (out_w - used,), jnp.float32))
        out_ref[...] = jnp.concatenate(pieces, axis=-1)

    return kernel


def post_process_hoi_kernel(outputs, target_sizes, *, use_matching=True,
                            compute_is_scores=False, batch_tile=None):
    f32 = jnp.float32
    obj_logits = outputs['pred_obj_logits']
    verb_logits = outputs['pred_verb_logits']
    sub_boxes = outputs['pred_sub_boxes']
    obj_boxes = outputs['pred_obj_boxes']
    B, Q, C = obj_logits.shape
    V = verb_logits.shape[-1]
    assert target_sizes.shape == (B, 2)

    # Pack every per-query input into one (B, Q, IN_W) slab.
    # TODO(synk): emit this packed layout directly from the model head to avoid
    # the wrapper-side concat pass.
    in_parts = [('obj_logits', obj_logits), ('verb_logits', verb_logits)]
    if use_matching:
        in_parts.append(('matching_logits', outputs['pred_matching_logits']))
    if compute_is_scores:
        in_parts.append(('is_logits', outputs['pred_is_logits']))
    in_parts += [('sub_boxes', sub_boxes), ('obj_boxes', obj_boxes)]
    in_off, off = {}, 0
    for name, arr in in_parts:
        in_off[name] = off
        off += int(arr.shape[-1])
    IN_W = off
    packed_in = jnp.concatenate([a.astype(f32) for _, a in in_parts], axis=-1)

    # Lane-dense packed output width (>= 128, multiple of 128).
    used = V + 4 + 4 + 1 + 1 + (1 if use_matching else 0) + (1 if compute_is_scores else 0)
    OUT_W = max(128, -(-used // 128) * 128)

    # Per-batch (w, h) scale as a tiny VMEM input (replaces scalar prefetch).
    ts = target_sizes.astype(f32)
    wh = jnp.stack([ts[:, 1], ts[:, 0]], axis=-1)[:, None, :]           # (B,1,2) [w,h]

    TB = batch_tile if batch_tile is not None else _pick_batch_tile(B)
    assert B % TB == 0, "batch_tile must divide the batch size"
    grid = (B // TB,)

    kernel = _make_kernel(C, V, in_off, OUT_W, use_matching, compute_is_scores)

    packed_out = pl.pallas_call(
        kernel,
        out_shape=jax.ShapeDtypeStruct((B, Q, OUT_W), f32),
        grid_spec=pltpu.PrefetchScalarGridSpec(
            num_scalar_prefetch=0,
            grid=grid,
            in_specs=[pl.BlockSpec((TB, Q, IN_W), lambda i: (i, 0, 0)),
                      pl.BlockSpec((TB, 1, 2), lambda i: (i, 0, 0))],
            out_specs=pl.BlockSpec((TB, Q, OUT_W), lambda i: (i, 0, 0)),
        ),
        compiler_params=pltpu.CompilerParams(
            dimension_semantics=("parallel",)),
    )(packed_in, wh)

    # Cheap host/XLA-side unpack of the packed slab.
    o = 0
    verb_scores = packed_out[:, :, o:o + V]; o += V
    sub_out = packed_out[:, :, o:o + 4]; o += 4
    obj_out = packed_out[:, :, o:o + 4]; o += 4
    obj_scores = packed_out[:, :, o]; o += 1
    obj_labels = packed_out[:, :, o].astype(jnp.int32); o += 1
    raw = {'obj_scores': obj_scores, 'obj_labels': obj_labels,
           'verb_scores': verb_scores, 'sub_boxes': sub_out, 'obj_boxes': obj_out}
    if use_matching:
        raw['matching_scores'] = packed_out[:, :, o]; o += 1
    if compute_is_scores:
        raw['is_scores'] = packed_out[:, :, o]; o += 1
    return raw


def assemble_results(raw, subject_category_id):
    # Host-side glue: per-image dicts, label/box concatenation, id ranges.
    obj_scores = np.asarray(raw['obj_scores'])
    obj_labels = np.asarray(raw['obj_labels'])
    verb_scores = np.asarray(raw['verb_scores'])
    sub_boxes = np.asarray(raw['sub_boxes'])
    obj_boxes = np.asarray(raw['obj_boxes'])
    results = []
    for i in range(obj_scores.shape[0]):
        ol = obj_labels[i]
        sl = np.full_like(ol, subject_category_id)
        labels = np.concatenate([sl, ol])
        boxes = np.concatenate([sub_boxes[i], obj_boxes[i]], axis=0)
        ids = np.arange(boxes.shape[0])
        results.append({
            'labels': labels,
            'boxes': boxes,
            'verb_scores': verb_scores[i],      # already * obj_score * matching_score
            'sub_ids': ids[: ids.shape[0] // 2],
            'obj_ids': ids[ids.shape[0] // 2:],
        })
    return results


def reference_jax(outputs, target_sizes, use_matching=True):
    obj_prob = jax.nn.softmax(outputs['pred_obj_logits'], -1)
    obj_scores = obj_prob[..., :-1].max(-1)
    obj_labels = obj_prob[..., :-1].argmax(-1)
    verb_scores = jax.nn.sigmoid(outputs['pred_verb_logits'])
    is_scores = jax.nn.softmax(outputs['pred_is_logits'], -1)[..., 1]
    h, w = target_sizes[:, 0], target_sizes[:, 1]
    scale = jnp.stack([w, h, w, h], axis=1).astype(jnp.float32)

    def cxcywh_to_xyxy(b):
        cx, cy, ww, hh = b[..., 0], b[..., 1], b[..., 2], b[..., 3]
        return jnp.stack([cx - 0.5 * ww, cy - 0.5 * hh,
                          cx + 0.5 * ww, cy + 0.5 * hh], -1)

    sb = cxcywh_to_xyxy(outputs['pred_sub_boxes']) * scale[:, None, :]
    ob = cxcywh_to_xyxy(outputs['pred_obj_boxes']) * scale[:, None, :]
    vs = verb_scores * obj_scores[..., None]
    ms = None
    if use_matching:
        ms = jax.nn.softmax(outputs['pred_matching_logits'], -1)[..., 1]
        vs = vs * ms[..., None]
    return obj_scores, obj_labels, vs, sb, ob, is_scores, ms


if __name__ == "__main__":
    # Small synthetic shapes consistent with the forward pass.
    B, Q = 2, 8
    NUM_OBJ_CLASSES = 16   # 15 object classes + 1 "no object"
    NUM_VERBS = 32
    SUBJECT_CATEGORY_ID = 0
    USE_MATCHING = True

    key = jax.random.PRNGKey(0)
    ks = jax.random.split(key, 6)
    outputs = {
        'pred_obj_logits': jax.random.normal(ks[0], (B, Q, NUM_OBJ_CLASSES), jnp.float32),
        'pred_verb_logits': jax.random.normal(ks[1], (B, Q, NUM_VERBS), jnp.float32),
        'pred_matching_logits': jax.random.normal(ks[2], (B, Q, 2), jnp.float32),
        'pred_is_logits': jax.random.normal(ks[3], (B, Q, 2), jnp.float32),
        'pred_sub_boxes': jax.random.uniform(ks[4], (B, Q, 4), jnp.float32, 0.1, 0.9),
        'pred_obj_boxes': jax.random.uniform(ks[5], (B, Q, 4), jnp.float32, 0.1, 0.9),
    }
    target_sizes = jnp.array([[480, 640], [512, 384]], dtype=jnp.int32)  # (h, w)

    raw = post_process_hoi_kernel(outputs, target_sizes, use_matching=USE_MATCHING)
    jax.block_until_ready(list(raw.values()))
    results = assemble_results(raw, SUBJECT_CATEGORY_ID)

    # Correctness check against a plain-JAX reference of the same forward math.
    r_os, r_ol, r_vs, r_sb, r_ob, r_is, r_ms = reference_jax(
        outputs, target_sizes, use_matching=USE_MATCHING)
    np.testing.assert_allclose(np.asarray(raw['obj_scores']),
                               np.asarray(r_os), rtol=1e-5, atol=1e-5)
    np.testing.assert_array_equal(np.asarray(raw['obj_labels']),
                                  np.asarray(r_ol))
    np.testing.assert_allclose(np.asarray(raw['verb_scores']),
                               np.asarray(r_vs), rtol=1e-5, atol=1e-5)
    np.testing.assert_allclose(np.asarray(raw['sub_boxes']),
                               np.asarray(r_sb), rtol=1e-5, atol=1e-3)
    np.testing.assert_allclose(np.asarray(raw['obj_boxes']),
                               np.asarray(r_ob), rtol=1e-5, atol=1e-3)
    np.testing.assert_allclose(np.asarray(raw['matching_scores']),
                               np.asarray(r_ms), rtol=1e-5, atol=1e-5)
    # is_scores is dead code in the PyTorch results; dropped by default
    # (compute_is_scores=False) per the performance review.

    assert len(results) == B
    assert results[0]['labels'].shape == (2 * Q,)
    assert results[0]['boxes'].shape == (2 * Q, 4)
    assert results[0]['verb_scores'].shape == (Q, NUM_VERBS)

    print("KERNEL_OK")
</pallas_src>

<mosaic_0001>
module attributes {stable_mosaic.version = 11 : i64} {
  func.func @kernel(%arg0: i32, %arg1: memref<1x8x58xf32, #tpu.memory_space<vmem>>, %arg2: memref<1x1x2xf32, #tpu.memory_space<vmem>>, %arg3: memref<1x8x128xf32, #tpu.memory_space<vmem>>) attributes {dimension_semantics = [#tpu.dimension_semantics<parallel>], iteration_bounds = array<i64: 2>, scalar_prefetch = 0 : i64, scratch_operands = 0 : i64, tpu.core_type = #tpu.core_type<tc>, window_params = [{transform_indices = @transform_0, window_bounds = array<i64: 1, 8, 58>}, {transform_indices = @transform_1, window_bounds = array<i64: 1, 1, 2>}, {transform_indices = @transform_2, window_bounds = array<i64: 1, 8, 128>}]} {
    %c0 = arith.constant 0 : index
    %c0_0 = arith.constant 0 : index
    %c0_1 = arith.constant 0 : index
    %0 = vector.load %arg1[%c0, %c0_0, %c0_1] : memref<1x8x58xf32, #tpu.memory_space<vmem>>, vector<1x8x16xf32>
    %cst = arith.constant dense<0xFF800000> : vector<1x8xf32>
    %1 = vector.multi_reduction <maximumf>, %0, %cst [2] : vector<1x8x16xf32> to vector<1x8xf32>
    %2 = vector.shape_cast %1 : vector<1x8xf32> to vector<1x8x1xf32>
    %3 = vector.broadcast %2 : vector<1x8x1xf32> to vector<1x8x16xf32>
    %4 = arith.subf %0, %3 : vector<1x8x16xf32>
    %5 = math.exp %4 : vector<1x8x16xf32>
    %cst_2 = arith.constant dense<0.000000e+00> : vector<1x8xf32>
    %6 = vector.multi_reduction <add>, %5, %cst_2 [2] : vector<1x8x16xf32> to vector<1x8xf32>
    %7 = vector.shape_cast %6 : vector<1x8xf32> to vector<1x8x1xf32>
    %8 = tpu.iota {dimensions = array<i32: 2>} : vector<1x8x16xi32>
    %c15_i32 = arith.constant 15 : i32
    %9 = vector.broadcast %c15_i32 : i32 to vector<1x8x16xi32>
    %10 = arith.cmpi slt, %8, %9 : vector<1x8x16xi32>
    %cst_3 = arith.constant 0xFF800000 : f32
    %11 = vector.broadcast %cst_3 : f32 to vector<1x8x16xf32>
    %12 = arith.select %10, %0, %11 : vector<1x8x16xi1>, vector<1x8x16xf32>
    %cst_4 = arith.constant dense<0xFF800000> : vector<1x8xf32>
    %13 = vector.multi_reduction <maximumf>, %12, %cst_4 [2] : vector<1x8x16xf32> to vector<1x8xf32>
    %14 = vector.shape_cast %13 : vector<1x8xf32> to vector<1x8x1xf32>
    %15 = arith.subf %14, %2 : vector<1x8x1xf32>
    %16 = math.exp %15 : vector<1x8x1xf32>
    %17 = arith.divf %16, %7 : vector<1x8x1xf32>
    %18 = vector.broadcast %14 : vector<1x8x1xf32> to vector<1x8x16xf32>
    %19 = arith.cmpf oeq, %12, %18 : vector<1x8x16xf32>
    %c16_i32 = arith.constant 16 : i32
    %20 = vector.broadcast %c16_i32 : i32 to vector<1x8x16xi32>
    %21 = arith.select %19, %8, %20 : vector<1x8x16xi1>, vector<1x8x16xi32>
    %cst_5 = arith.constant dense<2147483647> : vector<1x8xi32>
    %22 = vector.multi_reduction <minsi>, %21, %cst_5 [2] : vector<1x8x16xi32> to vector<1x8xi32>
    %23 = vector.shape_cast %22 : vector<1x8xi32> to vector<1x8x1xi32>
    %24 = arith.sitofp %23 : vector<1x8x1xi32> to vector<1x8x1xf32>
    %c0_6 = arith.constant 0 : index
    %c0_7 = arith.constant 0 : index
    %c16 = arith.constant 16 : index
    %25 = vector.load %arg1[%c0_6, %c0_7, %c16] : memref<1x8x58xf32, #tpu.memory_space<vmem>>, vector<1x8x32xf32>
    %26 = arith.negf %25 : vector<1x8x32xf32>
    %27 = math.exp %26 : vector<1x8x32xf32>
    %cst_8 = arith.constant 1.000000e+00 : f32
    %28 = vector.broadcast %cst_8 : f32 to vector<1x8x32xf32>
    %29 = arith.addf %28, %27 : vector<1x8x32xf32>
    %30 = arith.divf %28, %29 : vector<1x8x32xf32>
    %31 = vector.broadcast %17 : vector<1x8x1xf32> to vector<1x8x32xf32>
    %32 = arith.mulf %30, %31 : vector<1x8x32xf32>
    %c0_9 = arith.constant 0 : index
    %c0_10 = arith.constant 0 : index
    %c48 = arith.constant 48 : index
    %33 = vector.load %arg1[%c0_9, %c0_10, %c48] : memref<1x8x58xf32, #tpu.memory_space<vmem>>, vector<1x8x2xf32>
    %34 = vector.extract_strided_slice %33 {offsets = [0, 0, 1], sizes = [1, 8, 1], strides = [1, 1, 1]} : vector<1x8x2xf32> to vector<1x8x1xf32>
    %35 = vector.extract_strided_slice %33 {offsets = [0, 0, 0], sizes = [1, 8, 1], strides = [1, 1, 1]} : vector<1x8x2xf32> to vector<1x8x1xf32>
    %36 = arith.subf %34, %35 : vector<1x8x1xf32>
    %37 = arith.negf %36 : vector<1x8x1xf32>
    %38 = math.exp %37 : vector<1x8x1xf32>
    %cst_11 = arith.constant 1.000000e+00 : f32
    %39 = vector.broadcast %cst_11 : f32 to vector<1x8x1xf32>
    %40 = arith.addf %39, %38 : vector<1x8x1xf32>
    %41 = arith.divf %39, %40 : vector<1x8x1xf32>
    %42 = vector.broadcast %41 : vector<1x8x1xf32> to vector<1x8x32xf32>
    %43 = arith.mulf %32, %42 : vector<1x8x32xf32>
    %c0_12 = arith.constant 0 : index
    %c0_13 = arith.constant 0 : index
    %c0_14 = arith.constant 0 : index
    %44 = vector.load %arg2[%c0_12, %c0_13, %c0_14] : memref<1x1x2xf32, #tpu.memory_space<vmem>>, vector<1x1x2xf32>
    %c0_15 = arith.constant 0 : index
    %c0_16 = arith.constant 0 : index
    %c50 = arith.constant 50 : index
    %45 = vector.load %arg1[%c0_15, %c0_16, %c50] : memref<1x8x58xf32, #tpu.memory_space<vmem>>, vector<1x8x4xf32>
    %46 = vector.extract_strided_slice %45 {offsets = [0, 0, 0], sizes = [1, 8, 2], strides = [1, 1, 1]} : vector<1x8x4xf32> to vector<1x8x2xf32>
    %47 = vector.extract_strided_slice %45 {offsets = [0, 0, 2], sizes = [1, 8, 2], strides = [1, 1, 1]} : vector<1x8x4xf32> to vector<1x8x2xf32>
    %cst_17 = arith.constant 5.000000e-01 : f32
    %48 = vector.broadcast %cst_17 : f32 to vector<1x8x2xf32>
    %49 = arith.mulf %48, %47 : vector<1x8x2xf32>
    %50 = arith.subf %46, %49 : vector<1x8x2xf32>
    %51 = vector.broadcast %44 : vector<1x1x2xf32> to vector<1x8x2xf32>
    %52 = arith.mulf %50, %51 : vector<1x8x2xf32>
    %cst_18 = arith.constant 5.000000e-01 : f32
    %53 = vector.broadcast %cst_18 : f32 to vector<1x8x2xf32>
    %54 = arith.mulf %53, %47 : vector<1x8x2xf32>
    %55 = arith.addf %46, %54 : vector<1x8x2xf32>
    %56 = vector.broadcast %44 : vector<1x1x2xf32> to vector<1x8x2xf32>
    %57 = arith.mulf %55, %56 : vector<1x8x2xf32>
    %c0_19 = arith.constant 0 : index
    %c0_20 = arith.constant 0 : index
    %c54 = arith.constant 54 : index
    %58 = vector.load %arg1[%c0_19, %c0_20, %c54] : memref<1x8x58xf32, #tpu.memory_space<vmem>>, vector<1x8x4xf32>
    %59 = vector.extract_strided_slice %58 {offsets = [0, 0, 0], sizes = [1, 8, 2], strides = [1, 1, 1]} : vector<1x8x4xf32> to vector<1x8x2xf32>
    %60 = vector.extract_strided_slice %58 {offsets = [0, 0, 2], sizes = [1, 8, 2], strides = [1, 1, 1]} : vector<1x8x4xf32> to vector<1x8x2xf32>
    %cst_21 = arith.constant 5.000000e-01 : f32
    %61 = vector.broadcast %cst_21 : f32 to vector<1x8x2xf32>
    %62 = arith.mulf %61, %60 : vector<1x8x2xf32>
    %63 = arith.subf %59, %62 : vector<1x8x2xf32>
    %64 = vector.broadcast %44 : vector<1x1x2xf32> to vector<1x8x2xf32>
    %65 = arith.mulf %63, %64 : vector<1x8x2xf32>
    %cst_22 = arith.constant 5.000000e-01 : f32
    %66 = vector.broadcast %cst_22 : f32 to vector<1x8x2xf32>
    %67 = arith.mulf %66, %60 : vector<1x8x2xf32>
    %68 = arith.addf %59, %67 : vector<1x8x2xf32>
    %69 = vector.broadcast %44 : vector<1x1x2xf32> to vector<1x8x2xf32>
    %70 = arith.mulf %68, %69 : vector<1x8x2xf32>
    %cst_23 = arith.constant 0.000000e+00 : f32
    %71 = vector.broadcast %cst_23 : f32 to vector<1x8x85xf32>
    %72 = tpu.concatenate %43, %52, %57, %65, %70, %17, %24, %41, %71 in 2 : vector<1x8x32xf32>, vector<1x8x2xf32>, vector<1x8x2xf32>, vector<1x8x2xf32>, vector<1x8x2xf32>, vector<1x8x1xf32>, vector<1x8x1xf32>, vector<1x8x1xf32>, vector<1x8x85xf32> -> vector<1x8x128xf32>
    %c0_24 = arith.constant 0 : index
    %c0_25 = arith.constant 0 : index
    %c0_26 = arith.constant 0 : index
    %73 = vector.load %arg3[%c0_24, %c0_25, %c0_26] : memref<1x8x128xf32, #tpu.memory_space<vmem>>, vector<1x8x128xf32>
    tpu.vector_store %arg3[%c0_24, %c0_25, %c0_26], %72 {strides = array<i32>} : memref<1x8x128xf32, #tpu.memory_space<vmem>>, vector<1x8x128xf32>,
    return
  }
  func.func @transform_0(%arg0: i32) -> (i32, i32, i32) {
    %c0_i32 = arith.constant 0 : i32
    %c0_i32_0 = arith.constant 0 : i32
    %c0_i32_1 = arith.constant 0 : i32
    return %arg0, %c0_i32, %c0_i32_0 : i32, i32, i32
  }
  func.func @transform_1(%arg0: i32) -> (i32, i32, i32) {
    %c0_i32 = arith.constant 0 : i32
    %c0_i32_0 = arith.constant 0 : i32
    %c0_i32_1 = arith.constant 0 : i32
    return %arg0, %c0_i32, %c0_i32_0 : i32, i32, i32
  }
  func.func @transform_2(%arg0: i32) -> (i32, i32, i32) {
    %c0_i32 = arith.constant 0 : i32
    %c0_i32_0 = arith.constant 0 : i32
    %c0_i32_1 = arith.constant 0 : i32
    return %arg0, %c0_i32, %c0_i32_0 : i32, i32, i32
  }
}

</mosaic_0001>

<bundles_post_ra>
// kernel: tpu_custom_call.1
= control target key start
LH: loop header
LB: loop body
LE: loop exit
PB: predicated region body
PF: predicated region fallthrough
CT: control target
= control target key end

     0   :  { %7 = vsyncpa [#allocation3], 0  ;;  %s790_s0 = inlined_call_operand.hbm [shape: f32[2,8,58], index: 0, kind: input, shape index: {}]   ;;  %s791_s1 = inlined_call_operand.vmem [shape: f32[2,1,2], index: 1, kind: input, shape index: {}]   ;;  %s792_s2 = inlined_call_operand.hbm [shape: f32[2,8,128], index: 2, kind: output, shape index: {}]  }
   0x1   :  { %9 = vsyncpa [#allocation3 + $0x1], 0 }
   0x2   :  { %10 = vsyncpa [#allocation4], 0 }
   0x3   :  { %12 = vsyncpa [#allocation4 + $0x1], 0  ;;  %s601_s9 = smov 0   ;;  %s603_s10 = smov 0  }
   0x4   :  { %s605_s11 = smov 0   ;;  %s607_s12 = smov 0  }
   0x5 LB: > { %s622_s13 = sadd.s32 4294967295, %s574_s12   ;;  %s394_s14 = sadd.s32 4294967294, %s574_s12   ;;  %s574_s12 = sphi %s607_s12, %s807_s12   ;;  %s570_s11 = sphi %s605_s11, %s806_s11   ;;  %s566_s10 = sphi %s603_s10, %s805_s10   ;;  %s562_s9 = sphi %s601_s9, %s804_s9  }
   0x6   : > { %s626_s15 = sadd.s32 1, %s574_s12   ;;  %s25_s16 = sadd.s32 1, %s570_s11 }
   0x7   : > { %s22_s17 = ssub.s32 %s574_s12, %s626_s15  ;;  %p32_p0 = scmp.ne.s32.totalorder %s570_s11, %s566_s10 }
   0x8   : > { %p23_p1 = scmp.eq.s32.totalorder %s22_s17, 0  ;;  %p33_p2 = scmp.eq.s32.totalorder %s574_s12, 0 }
   0x9   : > { %p38_p3 = scmp.ne.s32.totalorder %s566_s10, %s562_s9  ;;  %p39_p4 = scmp.eq.s32.totalorder %s622_s13, 0 }
   0xa   : > { %s638_s18 = scalar_select %p23_p1, %s570_s11, %s25_s16  }
   0xb   : > { %p640_p5 = por %p33_p2, %p32_p0  ;;  %p644_p6 = por %p39_p4, %p38_p3 }
   0xc   : > { %p88_p7 = scmp.eq.s32.totalorder %s622_s13, 1  ;;  %p94_p8 = scmp.eq.s32.totalorder %s394_s14, 1 }
   0xd   : > { %p421_p10 = scmp.lt.s32.totalorder %s574_s12, 2  ;;  %s114_s23 = sand.u32 1, %s570_s11  }
   0xe   : > { %p651_p11 = por %p88_p7, %p32_p0  ;;  %p655_p12 = por %p94_p8, %p38_p3 }
   0xf   : > { %s398_s24 = sshll.u32 %s574_s12, 7  ;;  %s397_s25 = sshll.u32 %s114_s23, 3 }
  0x10   : > { %s796_s21 = scalar_select %p651_p11, 1, 0 }
  0x11   : > { %s797_s22 = scalar_select %p655_p12, 1, 0 }
  0x12   : > { %s664_s28 = scalar_lea.hbm %s790_s0, %s398_s24  ;;  %s118_s29 = scalar_lea.vmem [#allocation2], %s397_s25 }
  0x13   : > { %s125_s30 = sshll.u32 %s118_s29, 4  ;;  %p668_p13 = pnand %p421_p10, %p640_p5  ;;  %s672_s30 = int_to_ptr.vmem [resolvable:$true] %s125_s30 }
  0x14   : > { %s115_s4 = scalar_lea.sflag [#allocation3], %s114_s23  ;;  %s478_s5 = scalar_lea.hbm %s664_s28, 128 }
  0x15   : > { %p479_p2 = scmp.ne.s32.totalorder %s664_s28, %s478_s5  ;;  %p480_p3 = pneg %p668_p13 }
  0x16   : > { %s483_s8 = scalar_lea.hbm %s790_s0, 256  ;;  %p484_p5 = scmp.lt.u32.totalorder %s664_s28, %s790_s0 }
  0x17   : > { %p481_p4 = pnand %p480_p3, %p479_p2  ;;  %p485_p8 = scmp.lt.u32.totalorder %s483_s8, %s478_s5 }
  0x18   : > { %p487_p9 = scmp.lt.u32.totalorder %s478_s5, %s664_s28 }
  0x19   : > { %p482_p7 = pneg %p481_p4  ;;  %p486_p10 = por %p485_p8, %p484_p5 }
  0x1b   : > { %p488_p0 = por %p487_p9, %p486_p10 }
  0x1d   : > { %p489_p1 = pnand %p488_p0, %p482_p7 }
  0x1f   : > { %492 = shalt.err (!%p489_p1)
}
  0x20   : > { %s493_s17 = scalar_lea.vmem %s672_s30, 128  ;;  %s576_s19 = smov [#allocation2]  }
  0x21   : > { %p494_p2 = scmp.ne.s32.totalorder %s672_s30, %s493_s17  ;;  %s498_s23 = sshll.u32 %s576_s19, 4  ;;  %s499_s23 = int_to_ptr.vmem [resolvable:$false] %s498_s23 }
  0x22   : > { %s500_s24 = scalar_lea.vmem %s499_s23, 256  ;;  %p501_p11 = scmp.lt.s32.totalorder %s672_s30, %s499_s23 }
  0x23   : > { %p496_p4 = pnand %p494_p2, %p480_p3  ;;  %p502_p5 = scmp.lt.s32.totalorder %s500_s24, %s493_s17 }
  0x25   : > { %p497_p12 = pneg %p496_p4  ;;  %p503_p8 = por %p502_p5, %p501_p11 }
  0x27   : > { %p504_p9 = pnand %p503_p8, %p497_p12 }
  0x29   : > { %507 = shalt.err (!%p504_p9)
}
  0x2a   : > { %416 = dma.hbm_to_vmem [thread:$0]  (!%p668_p13), %s664_s28, 128, %s672_s30, %s115_s4  }
  0x2b   : > { %p799_p0 = scmp.lt.s32.totalorder %s574_s12, 3  ;;  %p800_p1 = scmp.ge.s32.totalorder %s574_s12, 1 }
  0x2d   : > { %p137_p3 = pnand %p800_p1, %p799_p0 }
  0x2e   : > { %s706_s25 = sand.u32 (!%p137_p3), 1, %s566_s10  }
  0x2f   : > { %140 = sbr.rel (%p137_p3) target bundleno = 539 (0x21b), region = 28  ;;  %s400_s26 = sshll.u32 (!%p137_p3), %s706_s25, 3 }
  0x30   : > { %s143_s27 = scalar_lea.sflag (!%p137_p3), [#allocation3], %s706_s25  ;;  %s146_s29 = scalar_lea.vmem (!%p137_p3), [#allocation2], %s400_s26 }
  0x36   : > { %553 = dma.done.wait (%p644_p6), %s143_s27, 128  }
  0x37   : > { %555 = vsyncadd (%p644_p6), %s143_s27, 4294967168  ;;  %v184_v0 = vlaneseq  ;;  %vm174_vm0 = vcmask 130048   ;;  %v716_v2 = vld [vmem:[%s146_s29] sm:$0xff]  ;;  %s577_s28 = smov 1   ;;  %s578_s20 = smov 126   ;;  %v579_v7 = vmov 49  }
  0x38   : > { %222 = vrot.lane.b32.xlu1 %v716_v2, %s577_s28  ;;  %v175_v3 = vsel %vm174_vm0, %v716_v2, -inf  ;;  %v239_v5 = vmul.f32 0.5, %v716_v2  ;;  %463 = vset.pattern.permute.xlu0 %v579_v7  ;;  %p170_p6 = scmp.lt.s32.totalorder %s622_s13, 1  ;;  %s580_s6 = smov 54   ;;  %v402_v25 = vmul.f32 -1.442695, %v716_v2 }
  0x39   : > { %v185_v1 = vand.u32 127, %v184_v0  ;;  %176 = vmax.xlane.f32.xlu0 %v175_v3  ;;  %s581_s7 = smov 50   ;;  %s582_s8 = smov 110   ;;  %vm284_vm4 = vcmask 261120   ;;  %vm286_vm5 = vcmask 277504   ;;  %vm288_vm6 = vcmask 293888  }
  0x3a   : > { %s171_s30 = scalar_select %p170_p6, %s622_s13, 1  ;;  %vm290_vm7 = vcmask 310272   ;;  %vm292_vm8 = vcmask 326656   ;;  %vm294_vm9 = vcmask 334848   ;;  %vm296_vm10 = vcmask 343040  }
  0x3b   : > { %vm186_vm1 = vcmp.lt.s32.totalorder %v185_v1, 15  ;;  %s583_s14 = smov 112   ;;  %s584_s16 = smov 121   ;;  %vm298_vm11 = vcmask 351232  }
  0x3c   : > { %v187_v4 = vsel %vm186_vm1, %v716_v2, -inf  ;;  %241 = vrot.lane.b32.xlu1 %v239_v5, %s578_s20  ;;  %s172_s5 = scalar_lea.vmem %s791_s1, %s171_s30  ;;  %s406_s17 = sshll.u32 %s622_s13, 7 }
  0x3d   : > { %v188_v6 = vsel %vm174_vm0, %v187_v4, -inf  ;;  %v404_v24 = vld [vmem:[%s172_s5] ss:$0 sm:$0xff]  ;;  %s169_s19 = scalar_lea.vmem [#allocation5], %s400_s26  ;;  %s746_s29 = scalar_lea.hbm %s792_s2, %s406_s17 }
  0x3e   : > { %189 = vmax.xlane.f32.xlu0 %v188_v6  ;;  %s315_s23 = sshll.u32 %s169_s19, 4  ;;  %s302_s13 = scalar_lea.sflag [#allocation4], %s706_s25  ;;  %s748_s23 = int_to_ptr.vmem [resolvable:$true] %s315_s23 }
  0x3f   : > { %s508_s26 = scalar_lea.vmem %s748_s23, 128  ;;  %p801_p12 = scmp.ne.s32.totalorder %s796_s21, 0 }
  0x40   : > { %p509_p11 = scmp.ne.s32.totalorder %s748_s23, %s508_s26  ;;  %s585_s28 = smov [#allocation5]  }
  0x41   : > { %s512_s20 = sshll.u32 %s585_s28, 4  ;;  %s513_s20 = int_to_ptr.vmem [resolvable:$false] %s512_s20 }
  0x42   : > { %p510_p13 = pnand %p509_p11, %p801_p12  ;;  %s514_s30 = scalar_lea.vmem %s513_s20, 256 }
  0x43   : > { %p515_p10 = scmp.lt.s32.totalorder %s748_s23, %s513_s20  ;;  %p516_p2 = scmp.lt.s32.totalorder %s514_s30, %s508_s26 }
  0x44   : > { %p511_p7 = pneg %p510_p13 }
  0x45   : > { %p517_p4 = por %p516_p2, %p515_p10 }
  0x47   : > { %p518_p5 = pnand %p517_p4, %p511_p7 }
  0xaa   : > { %v223_v8 = vpop.permute.xlu1 %222 }
  0xab   : > { %v225_v9 = vsub.f32 %v716_v2, %v223_v8 }
  0xad   : > { %v403_v10 = vmul.f32 -1.442695, %v225_v9 }
  0xae   : > { %v242_v26 = vpop.permute.xlu1 %241 }
  0xaf   : > { %464 = vpow2.f32 %v403_v10  ;;  %v244_v37 = vsub.f32 %v716_v2, %v242_v26  ;;  %v254_v41 = vadd.f32 %v242_v26, %v716_v2 }
  0xb9   : > { %v465_v11 = vpop.eup %464 }
  0xba   : > { %v229_v12 = vadd.f32 1.0, %v465_v11 }
  0xbc   : > { %466 = vrcp.f32 %v229_v12 }
  0xc6   : > { %v725_v13 = vpop.eup %466  ;;  %v177_v14 = vpop.xlane.xlu0 %176 }
  0xc7   : > { %v178_v15 = vsub.f32 %v716_v2, %v177_v14  ;;  %234 = vperm.xlu0 %463, %v725_v13  }
  0xc9   : > { %v179_v16 = vmul.f32 1.442695, %v178_v15 }
  0xcb   : > { %468 = vpow2.f32 %v179_v16  ;;  %v190_v17 = vpop.xlane.xlu0 %189 }
  0xcc   : > { %vm196_vm2 = vcmp.eq.f32.partialorder %v187_v4, %v190_v17  ;;  %470 = vpow2.f32 %v402_v25  ;;  %v191_v27 = vsub.f32 %v190_v17, %v177_v14 }
  0xcd   : > { %v197_v20 = vsel %vm196_vm2, %v185_v1, 16 }
  0xce   : > { %v198_v21 = vsel %vm174_vm0, %v197_v20, 2147483647  ;;  %v192_v30 = vmul.f32 1.442695, %v191_v27 }
  0xcf   : > { %v200_v22 = vshra.s32 %v198_v21, 16  ;;  %v199_v32 = vand.u32 65535, %v198_v21 }
  0xd1   : > { %v202_v23 = vcvt.s32.f32 %v200_v22  ;;  %v201_v35 = vcvt.s32.f32 %v199_v32 }
  0xd5   : > { %v469_v18 = vpop.eup %468 }
  0xd6   : > { %v181_v19 = vsel %vm174_vm0, %v469_v18, 0.0  ;;  %v471_v28 = vpop.eup %470 }
  0xd7   : > { %182 = vadd.xlane.f32.xlu1 %v181_v19  ;;  %v217_v33 = vadd.f32 1.0, %v471_v28 }
  0xe6   : > { %203 = vmin.xlane.f32.xlu0 %v202_v23 }
  0xe8   : > { %256 = vrot.lane.b32.xlu1 %v404_v24, %s580_s6 }
  0xfc   : > { %250 = vrot.lane.b32.xlu0 %v404_v24, %s581_s7 }
 0x146   : > { %v235_v31 = vpop.permute.xlu0 %234 }
 0x164   : > { %v183_v29 = vpop.xlane.xlu1 %182 }
 0x165   : > { %472 = vrcp.f32 %v183_v29 }
 0x166   : > { %474 = vpow2.f32 %v192_v30 }
 0x167   : > { %476 = vrcp.f32 %v217_v33 }
 0x168   : > { %v257_v46 = vpop.permute.xlu1 %256 }
 0x169   : > { %v259_v47 = vmul.f32 %v257_v46, %v244_v37  ;;  %v260_v50 = vmul.f32 %v257_v46, %v254_v41 }
 0x16f   : > { %v473_v40 = vpop.eup %472 }
 0x170   : > { %v475_v42 = vpop.eup %474 }
 0x171   : > { %v195_v44 = vmul.f32 %v475_v42, %v473_v40  ;;  %v477_v45 = vpop.eup %476 }
 0x173   : > { %v204_v34 = vpop.xlane.xlu0 %203  ;;  %v220_v48 = vmul.f32 %v477_v45, %v195_v44 }
 0x174   : > { %vm205_vm3 = vcmp.eq.f32.partialorder %v202_v23, %v204_v34  ;;  %v210_v56 = vcvt.f32.s32 %v204_v34 }
 0x175   : > { %v206_v36 = vsel %vm205_vm3, %v201_v35, inf  ;;  %v237_v49 = vmul.f32 %v235_v31, %v220_v48 }
 0x176   : > { %207 = vmin.xlane.f32.xlu0 %v206_v36  ;;  %v211_v61 = vshll.u32 %v210_v56, 16 }
 0x177   : > { %v251_v38 = vpop.permute.xlu0 %250 }
 0x178   : > { %v253_v39 = vmul.f32 %v251_v38, %v244_v37  ;;  %v255_v43 = vmul.f32 %v254_v41, %v251_v38 }
 0x17a   : > { %266 = vrot.lane.b32.xlu1 %v253_v39, %s582_s8 }
 0x17e   : > { %270 = vrot.lane.b32.xlu1 %v255_v43, %s583_s14 }
 0x182   : > { %274 = vrot.lane.b32.xlu1 %v259_v47, %s582_s8 }
 0x186   : > { %262 = vrot.lane.b32.xlu1 %v237_v49, %s583_s14 }
 0x18a   : > { %278 = vrot.lane.b32.xlu1 %v260_v50, %s583_s14 }
 0x18e   : > { %281 = vrot.lane.b32.xlu1 %v725_v13, %s584_s16 }
 0x1ec   : > { %v267_v51 = vpop.permute.xlu1 %266 }
 0x1f0   : > { %v271_v52 = vpop.permute.xlu1 %270 }
 0x1f4   : > { %v275_v53 = vpop.permute.xlu1 %274 }
 0x1f8   : > { %v263_v54 = vpop.permute.xlu1 %262 }
 0x1f9   : > { %v285_v55 = vsel %vm284_vm4, %v263_v54, %v267_v51 }
 0x1fa   : > { %v287_v57 = vsel %vm286_vm5, %v285_v55, %v271_v52 }
 0x1fb   : > { %v289_v58 = vsel %vm288_vm6, %v287_v57, %v275_v53 }
 0x1fc   : > { %v279_v59 = vpop.permute.xlu1 %278 }
 0x1fd   : > { %v291_v63 = vsel %vm290_vm7, %v289_v58, %v279_v59 }
 0x1fe   : > { %v293_v2 = vsel %vm292_vm8, %v291_v63, %v195_v44 }
 0x200   : > { %v282_v3 = vpop.permute.xlu1 %281 }
 0x203   : > { %v208_v60 = vpop.xlane.xlu0 %207 }
 0x204   : > { %v209_v62 = vcvt.f32.s32 %v208_v60 }
 0x206   : > { %v212_v0 = vadd.s32 %v211_v61, %v209_v62 }
 0x208   : > { %v213_v1 = vcvt.s32.f32 %v212_v0 }
 0x20a   : > { %v295_v4 = vsel %vm294_vm9, %v293_v2, %v213_v1 }
 0x20b   : > { %v297_v5 = vsel %vm296_vm10, %v295_v4, %v282_v3 }
 0x20c   : > { %v299_v6 = vsel %vm298_vm11, %v297_v5, 0.0 }
 0x20d   : > { %300 = vst [vmem:[%s169_s19] sm:$0xff] %v299_v6 }
 0x20e   : > { %521 = shalt.err (!%p518_p5)
}
 0x20f   : > { %s522_s25 = scalar_lea.hbm %s746_s29, 128  ;;  %s526_s5 = scalar_lea.hbm %s792_s2, 256 }
 0x210   : > { %p523_p8 = scmp.ne.s32.totalorder %s746_s29, %s522_s25  ;;  %p527_p1 = scmp.lt.u32.totalorder %s746_s29, %s792_s2 }
 0x211   : > { %p528_p3 = scmp.lt.u32.totalorder %s526_s5, %s522_s25  ;;  %p530_p11 = scmp.lt.u32.totalorder %s522_s25, %s746_s29 }
 0x212   : > { %p524_p9 = pnand %p523_p8, %p801_p12 }
 0x213   : > { %p529_p6 = por %p528_p3, %p527_p1 }
 0x214   : > { %p525_p0 = pneg %p524_p9 }
 0x215   : > { %p531_p13 = por %p530_p11, %p529_p6 }
 0x217   : > { %p532_p7 = pnand %p531_p13, %p525_p0 }
 0x219   : > { %535 = shalt.err (!%p532_p7)
}
 0x21a   : > { %411 = dma.vmem_to_hbm [thread:$0]  (%p801_p12), %s748_s23, 128, %s746_s29, %s302_s13  }
 0x21b PF: > { %s327_s8 = sand.u32 1, %s562_s9   ;;  %p802_p10 = scmp.ne.s32.totalorder %s797_s22, 0 }
 0x21c   : > { %p803_p2 = scmp.ge.s32.totalorder %s574_s12, 2  ;;  %s328_s14 = scalar_lea.sflag [#allocation4], %s327_s8 }
 0x21e   : > { %p418_p4 = pnand %p803_p2, %p802_p10 }
 0x220   : > { %557 = dma.done.wait (!%p418_p4), %s328_s14, 128  }
 0x221   : > { %559 = vsyncadd (!%p418_p4), %s328_s14, 4294967168  ;;  %p15_p5 = scmp.ge.s32.totalorder %s626_s15, 4   ;;  %s804_s9 = smov %s566_s10 }
 0x222   : > { %s805_s10 = smov %s570_s11  ;;  %s806_s11 = smov %s638_s18 }
 0x223   : > { %s807_s12 = smov %s626_s15  ;;  %17 = sbr.rel (!%p15_p5) target bundleno = 5 (0x5), region = 76 }
 0x22a   :  { %333 = vsyncpa [#allocation3], 1 }
 0x22b   :  { %335 = vsyncpa [#allocation3 + $0x1], 1 }
 0x22c   :  { %336 = vsyncpa [#allocation4], 1 }
 0x22d   :  { %338 = vsyncpa [#allocation4 + $0x1], 1 }

</bundles_post_ra>
